<compile_context>
chip_gen: v7x
topology: tpu7x:2x2x1
jax: 0.10.0
libtpu: 0.0.40
codegen_flags: <defaults>
</compile_context>

<pallas_src>
import functools

import jax
import jax.numpy as jnp
from jax.experimental import pallas as pl
from jax.experimental.pallas import tpu as pltpu


def _cast_kernel(x_ref, o_ref):
    # Elementwise dtype conversion on the VPU: load tile, cast, store.
    o_ref[...] = x_ref[...].astype(o_ref.dtype)


# Lane-dense slab widths, widest first (all multiples of 128).
_LANE_CANDIDATES = (4096, 2048, 1024, 512, 256, 128)
# Below this many combined (in + out) bytes, one block beats splitting the
# work across grid steps / TensorCores.
_SINGLE_BLOCK_MAX_BYTES = 2 * 1024 * 1024


def _round_up(v, m):
    return ((v + m - 1) // m) * m


def _step_config():
    """Generation-aware (combined_step_bytes, vmem_limit_bytes).

    Per-grid-step overhead is ~0.35 us regardless of step size, so chips with
    faster HBM want bigger steps.  VMEM capacity is the cleanest generation
    proxy Pallas exposes: 64 MiB/TC => v7x (~3.2 TB/s HBM/TC), 128 MiB =>
    v5e/v6e.
    """
    try:
        info = pltpu.get_tpu_info()
        vmem_cap = int(getattr(info, "vmem_capacity_bytes", 0)) or (128 << 20)
    except Exception:  # defensive: interpret mode / lookup failure
        vmem_cap = 128 << 20
    if vmem_cap <= (64 << 20):
        # v7x: 16 MiB combined step -> ~32 MiB double-buffered pipeline,
        # comfortably under the 64 MiB/TC physical VMEM.
        return 16 << 20, 48 << 20
    # v5e/v6e: 24 MiB steps sit on the flat part of the measured tile-size /
    # bandwidth curve; 64 MiB limit still leaves half of physical VMEM free.
    return 24 << 20, 64 << 20


def _pallas_cast_2d(x2d, target_dtype, tile_rows, grid_n, vmem_limit, bytes_accessed):
    n_rows, lanes = x2d.shape
    return pl.pallas_call(
        _cast_kernel,
        out_shape=jax.ShapeDtypeStruct((n_rows, lanes), target_dtype),
        grid_spec=pltpu.PrefetchScalarGridSpec(
            num_scalar_prefetch=0,
            grid=(grid_n,),
            # Default double buffering kept; pl.Buffered(3) had no measured
            # win to justify its extra VMEM.
            in_specs=[pl.BlockSpec((tile_rows, lanes), lambda i: (i, 0))],
            out_specs=pl.BlockSpec((tile_rows, lanes), lambda i: (i, 0)),
        ),
        compiler_params=pltpu.CompilerParams(
            # Parallel row axis: shards grid steps across both TensorCores on
            # v7x; harmless on single-core v5e/v6e.
            dimension_semantics=("parallel",),
            vmem_limit_bytes=vmem_limit,
        ),
        # Declare the kernel as pure bandwidth so XLA schedules the custom
        # call sensibly when it sits inside a larger jit program.
        cost_estimate=pl.CostEstimate(
            flops=0, transcendentals=0, bytes_accessed=bytes_accessed
        ),
    )(x2d)


def _pallas_cast_tiny(x_flat, target_dtype):
    # Whole array (< 128 elements) as one full-dims block: the (8, 128)
    # divisibility rule does not apply when block_shape == array dims.
    n = x_flat.shape[0]
    out = pl.pallas_call(
        _cast_kernel,
        out_shape=jax.ShapeDtypeStruct((1, n), target_dtype),
    )(x_flat.reshape(1, n))
    return out.reshape(n)


@functools.partial(jax.jit, static_argnames=("target_dtype",))
def pallas_cast(x: jax.Array, target_dtype) -> jax.Array:
    """Cast `x` to `target_dtype` (same semantics as torch.Tensor.to(dtype=...))."""
    target_dtype = jnp.dtype(target_dtype)
    orig_shape = x.shape
    n_total = x.size

    if x.dtype == target_dtype:
        return x
    if n_total == 0:
        return jnp.zeros(orig_shape, target_dtype)

    x_flat = jnp.ravel(x)

    if n_total < 128:
        return _pallas_cast_tiny(x_flat, target_dtype).reshape(orig_shape)

    in_item = jnp.dtype(x.dtype).itemsize
    out_item = target_dtype.itemsize
    # Sublane packing of the narrowest dtype involved (f32 -> 8, bf16 -> 16,
    # int8/fp8 -> 32): tile row counts are multiples of this so both the load
    # and the packed store stay on full, unmasked vectors.
    row_pack = max(8, 32 // max(1, min(in_item, out_item)))

    # 128-aligned prefix goes through Pallas; the <128-element tail (only when
    # numel is not a multiple of 128) is cast by plain XLA.  This avoids the
    # old path's full-array pad copy on input and slice copy on output.
    n_main = (n_total // 128) * 128
    if n_main == n_total:
        main = x_flat
    else:
        main = x_flat[:n_main]

    # Widest lane count that divides the prefix exactly -> no padding and an
    # unmasked, lane-dense output slab.
    lanes = next(w for w in _LANE_CANDIDATES if n_main % w == 0)
    n_rows = n_main // lanes

    row_bytes = lanes * (in_item + out_item)
    total_bytes = n_rows * row_bytes
    step_bytes, vmem_limit = _step_config()

    if total_bytes <= _SINGLE_BLOCK_MAX_BYTES:
        tile_rows = n_rows
        grid_n = 1
    else:
        # At least 2 (and an even number of) grid steps so both of v7x's
        # TensorCores get work and neither eats an odd tail step.
        n_steps = max(2, pl.cdiv(total_bytes, step_bytes))
        n_steps += n_steps % 2
        tile_rows = min(
            n_rows, max(row_pack, _round_up(pl.cdiv(n_rows, n_steps), row_pack))
        )
        grid_n = pl.cdiv(n_rows, tile_rows)
        # A ragged final block (tile_rows not dividing n_rows) is fine for an
        # elementwise cast: OOB reads are don't-care, OOB writes are dropped.

    out_main = _pallas_cast_2d(
        main.reshape(n_rows, lanes),
        target_dtype,
        tile_rows,
        grid_n,
        vmem_limit,
        bytes_accessed=n_main * (in_item + out_item),
    ).reshape(-1)

    if n_main == n_total:
        return out_main.reshape(orig_shape)

    tail_out = x_flat[n_main:].astype(target_dtype)  # <128 elements, negligible
    return jnp.concatenate([out_main, tail_out]).reshape(orig_shape)


if __name__ == "__main__":
    key = jax.random.PRNGKey(0)
    # Small NCHW input, consistent with the Cast module's elementwise use.
    x = jax.random.normal(key, (2, 4, 16, 16), dtype=jnp.float32) * 10.0

    # float32 -> bfloat16 (a representative target_dtype).
    y = pallas_cast(x, jnp.bfloat16)
    jax.block_until_ready(y)
    y_ref = x.astype(jnp.bfloat16)
    assert y.shape == x.shape
    assert y.dtype == jnp.dtype(jnp.bfloat16)
    assert bool(jnp.all(y == y_ref))

    # float32 -> int32 (truncation toward zero, matches torch .to(torch.int32)).
    y_int = pallas_cast(x, jnp.int32)
    jax.block_until_ready(y_int)
    assert bool(jnp.all(y_int == x.astype(jnp.int32)))

    # Size not a multiple of 128 exercises the tiny single-block path.
    x_small = jax.random.normal(jax.random.PRNGKey(1), (3, 5, 7), dtype=jnp.float32)
    y_small = pallas_cast(x_small, jnp.bfloat16)
    jax.block_until_ready(y_small)
    assert y_small.shape == x_small.shape
    assert bool(jnp.all(y_small == x_small.astype(jnp.bfloat16)))

    print("KERNEL_OK")
</pallas_src>

<mosaic_0001>
module attributes {stable_mosaic.version = 11 : i64} {
  func.func @_cast_kernel(%arg0: i32, %arg1: memref<1x2048xf32, #tpu.memory_space<vmem>>, %arg2: memref<1x2048xbf16, #tpu.memory_space<vmem>>) attributes {dimension_semantics = [#tpu.dimension_semantics<parallel>], iteration_bounds = array<i64: 1>, scalar_prefetch = 0 : i64, scratch_operands = 0 : i64, tpu.core_type = #tpu.core_type<tc>, window_params = [{transform_indices = @transform_0, window_bounds = array<i64: 1, 2048>}, {transform_indices = @transform_1, window_bounds = array<i64: 1, 2048>}]} {
    %c0 = arith.constant 0 : index
    %c0_0 = arith.constant 0 : index
    %0 = vector.load %arg1[%c0, %c0_0] : memref<1x2048xf32, #tpu.memory_space<vmem>>, vector<1x2048xf32>
    %1 = arith.truncf %0 : vector<1x2048xf32> to vector<1x2048xbf16>
    %c0_1 = arith.constant 0 : index
    %c0_2 = arith.constant 0 : index
    %2 = vector.load %arg2[%c0_1, %c0_2] : memref<1x2048xbf16, #tpu.memory_space<vmem>>, vector<1x2048xbf16>
    tpu.vector_store %arg2[%c0_1, %c0_2], %1 {strides = array<i32>} : memref<1x2048xbf16, #tpu.memory_space<vmem>>, vector<1x2048xbf16>,
    return
  }
  func.func @transform_0(%arg0: i32) -> (i32, i32) {
    %c0_i32 = arith.constant 0 : i32
    %c0_i32_0 = arith.constant 0 : i32
    return %arg0, %c0_i32 : i32, i32
  }
  func.func @transform_1(%arg0: i32) -> (i32, i32) {
    %c0_i32 = arith.constant 0 : i32
    %c0_i32_0 = arith.constant 0 : i32
    return %arg0, %c0_i32 : i32, i32
  }
}

</mosaic_0001>

<bundles_post_ra>
// kernel: pallas_cast.1
= control target key start
LH: loop header
LB: loop body
LE: loop exit
PB: predicated region body
PF: predicated region fallthrough
CT: control target
= control target key end

     0   :  { %6 = vsyncpa [#allocation3], 0  ;;  %s445_s0 = inlined_call_operand.hbm [shape: f32[1,2048], index: 0, kind: input, shape index: {}]   ;;  %s446_s1 = inlined_call_operand.hbm [shape: bf16[1,2048], index: 1, kind: output, shape index: {}]  }
   0x1   :  { %7 = vsyncpa [#allocation4], 0  ;;  %s348_s6 = smov [#allocation2]   ;;  %s300_s10 = scalar_lea.hbm %s445_s0, 256 }
   0x2   :  { %s14_s7 = sshll.u32 %s348_s6, 4  ;;  %p301_p0 = scmp.ne.s32.totalorder %s445_s0, %s300_s10  ;;  %s15_s7 = int_to_ptr.vmem [resolvable:$true] %s14_s7 }
   0x3   :  { %p304_p1 = scmp.lt.u32.totalorder %s300_s10, %s445_s0 }
   0x5   :  { %p306_p2 = pnand %p304_p1, %p301_p0 }
   0x7   :  { %309 = shalt.err (!%p306_p2)
}
   0x8   :  { %s310_s15 = scalar_lea.vmem %s15_s7, 256  ;;  %p315_p4 = scmp.lt.s32.totalorder %s15_s7, %s15_s7 }
   0x9   :  { %p311_p3 = scmp.ne.s32.totalorder %s15_s7, %s310_s15  ;;  %p316_p5 = scmp.lt.s32.totalorder %s310_s15, %s310_s15 }
   0xb   :  { %p317_p6 = por %p316_p5, %p315_p4 }
   0xd   :  { %p318_p7 = pnand %p317_p6, %p311_p3 }
   0xf   :  { %321 = shalt.err (!%p318_p7)
}
  0x10   :  { %17 = dma.hbm_to_vmem [thread:$0]  %s445_s0, 256, %s15_s7, [#allocation3]  }
  0x11   :  { %344 = dma.done.wait [#allocation3], 256  }
  0x12   :  { %345 = vsyncadd [#allocation3], 4294967040  ;;  %v25_v0 = vlaneseq  ;;  %vm237_vm0 = vcmask 1040384   ;;  %vm240_vm1 = vcmask 1041409   ;;  %v349_v1 = vmov 1966171168  }
  0x13   :  { %v142_v2 = vunpack.c.l.s4 %v349_v1  ;;  %vm238_vm2 = vsmask.f32 256  ;;  %vm241_vm3 = vsmask.f32 1280  ;;  %vm244_vm5 = vcmask 1042434   ;;  %v21_v16 = vld [vmem:[#allocation2] sm:$0xff] }
  0x14   :  { %v26_v3 = vshrl.u32 %v25_v0, 7  ;;  %vm373_vm4 = vmand %vm237_vm0, %vm238_vm2  ;;  %vm245_vm6 = vsmask.f32 2304  ;;  %vm248_vm8 = vcmask 1043459   ;;  %vm249_vm9 = vsmask.f32 3328 }
  0x15   :  { %v143_v5 = vunpack.c.0.s8 %v142_v2  ;;  %vm377_vm7 = vmand %vm240_vm1, %vm241_vm3  ;;  %vm252_vm10 = vcmask 1044484   ;;  %vm253_vm14 = vsmask.f32 4352  ;;  %vm256_vm15 = vcmask 1045509   ;;  %v22_v23 = vld [vmem:[#allocation2 + $0x8] sm:$0xff]  ;;  %v268_v60 = vld [vmem:[#allocation5] sm:$0xff] }
  0x16   :  { %v27_v7 = vsub.s32 0, %v26_v3  ;;  %v31_v8 = vsub.s32 1, %v26_v3  ;;  %v35_v9 = vsub.s32 2, %v26_v3  ;;  %v39_v10 = vsub.s32 3, %v26_v3  ;;  %vm243_vm11 = vmor %vm377_vm7, %vm373_vm4  ;;  %s350_s0 = smov [#allocation5]  }
  0x17   :  { %v43_v11 = vsub.s32 4, %v26_v3  ;;  %v47_v12 = vsub.s32 5, %v26_v3  ;;  %v51_v13 = vsub.s32 6, %v26_v3  ;;  %v55_v14 = vsub.s32 7, %v26_v3  ;;  %vm246_vm12 = vmand %vm244_vm5, %vm245_vm6  ;;  %s280_s18 = sshll.u32 %s350_s0, 4  ;;  %s281_s18 = int_to_ptr.vmem [resolvable:$true] %s280_s18 }
  0x18   :  { %vm387_vm13 = vmor %vm246_vm12, %vm243_vm11  ;;  %vm257_vm0 = vsmask.f32 5376  ;;  %vm260_vm1 = vcmask 1046534   ;;  %v146_v17 = vsub.s32 %v143_v5, %v26_v3  ;;  %vm261_vm3 = vsmask.f32 6400  ;;  %v271_v3 = vld [vmem:[#allocation5 + $0x8] sm:$0xff]  ;;  %p327_p9 = scmp.lt.s32.totalorder %s281_s18, %s281_s18 }
  0x19   :  { %vm393_vm2 = vmand %vm248_vm8, %vm249_vm9  ;;  %vm264_vm4 = vcmask 1047559   ;;  %vm265_vm7 = vsmask.f32 7424  ;;  %v28_v19 = vrot.slane %v21_v16, %v27_v7  ;;  %v32_v20 = vrot.slane %v21_v16, %v31_v8  ;;  %s322_s19 = scalar_lea.vmem %s281_s18, 256 }
  0x1a   :  { %v36_v21 = vrot.slane %v21_v16, %v35_v9  ;;  %v40_v22 = vrot.slane %v21_v16, %v39_v10  ;;  %vm251_vm5 = vmor %vm393_vm2, %vm387_vm13  ;;  %v44_v24 = vrot.slane %v21_v16, %v43_v11  ;;  %v48_v25 = vrot.slane %v21_v16, %v47_v12  ;;  %p323_p8 = scmp.ne.s32.totalorder %s281_s18, %s322_s19  ;;  %p328_p10 = scmp.lt.s32.totalorder %s322_s19, %s322_s19 }
  0x1b   :  { %v52_v26 = vrot.slane %v21_v16, %v51_v13  ;;  %v56_v27 = vrot.slane %v21_v16, %v55_v14  ;;  %vm254_vm6 = vmand %vm252_vm10, %vm253_vm14  ;;  %v289_v28 = vpack.c.bf16 %v32_v20, %v28_v19  ;;  %v60_v31 = vrot.slane %v22_v23, %v27_v7 }
  0x1c   :  { %v290_v29 = vpack.c.bf16 %v40_v22, %v36_v21  ;;  %vm403_vm8 = vmor %vm254_vm6, %vm251_vm5  ;;  %v64_v32 = vrot.slane %v22_v23, %v31_v8  ;;  %v291_v33 = vpack.c.bf16 %v48_v25, %v44_v24  ;;  %v68_v36 = vrot.slane %v22_v23, %v35_v9  ;;  %p329_p11 = por %p328_p10, %p327_p9 }
  0x1d   :  { %v292_v34 = vpack.c.bf16 %v56_v27, %v52_v26  ;;  %vm409_vm9 = vmand %vm256_vm15, %vm257_vm0  ;;  %v72_v37 = vrot.slane %v22_v23, %v39_v10  ;;  %v147_v38 = vrot.slane %v289_v28, %v146_v17  ;;  %v76_v40 = vrot.slane %v22_v23, %v43_v11 }
  0x1e   :  { %v154_v39 = vrot.slane %v290_v29, %v146_v17  ;;  %vm259_vm10 = vmor %vm409_vm9, %vm403_vm8  ;;  %v80_v41 = vrot.slane %v22_v23, %v47_v12  ;;  %v161_v42 = vrot.slane %v291_v33, %v146_v17  ;;  %v84_v44 = vrot.slane %v22_v23, %v51_v13  ;;  %p330_p12 = pnand %p329_p11, %p323_p8 }
  0x1f   :  { %v168_v43 = vrot.slane %v292_v34, %v146_v17  ;;  %vm262_vm11 = vmand %vm260_vm1, %vm261_vm3  ;;  %v88_v45 = vrot.slane %v22_v23, %v55_v14  ;;  %v293_v48 = vpack.c.bf16 %v64_v32, %v60_v31  ;;  %v294_v49 = vpack.c.bf16 %v72_v37, %v68_v36 }
  0x20   :  { %v169_v46 = vcombine.low %v147_v38, %v154_v39  ;;  %vm419_vm12 = vmor %vm262_vm11, %vm259_vm10  ;;  %v295_v50 = vpack.c.bf16 %v80_v41, %v76_v40 }
  0x21   :  { %v170_v51 = vcombine.low %v161_v42, %v168_v43  ;;  %vm425_vm13 = vmand %vm264_vm4, %vm265_vm7  ;;  %v296_v53 = vpack.c.bf16 %v88_v45, %v84_v44  ;;  %v196_v55 = vrot.slane %v293_v48, %v146_v17  ;;  %v203_v56 = vrot.slane %v294_v49, %v146_v17 }
  0x22   :  { %v177_v54 = vrot.slane %v169_v46, %v146_v17  ;;  %v210_v57 = vrot.slane %v295_v50, %v146_v17  ;;  %vm267_vm14 = vmor %vm425_vm13, %vm419_vm12 }
  0x23   :  { %v184_v58 = vrot.slane %v170_v51, %v146_v17  ;;  %v217_v59 = vrot.slane %v296_v53, %v146_v17  ;;  %v218_v61 = vcombine.low %v196_v55, %v203_v56 }
  0x25   :  { %v185_v62 = vcombine.low %v177_v54, %v184_v58  ;;  %v219_v63 = vcombine.low %v210_v57, %v217_v59  ;;  %v226_v0 = vrot.slane %v218_v61, %v146_v17 }
  0x27   :  { %v269_v1 = vsel %vm267_vm14, %v185_v62, %v268_v60  ;;  %v233_v2 = vrot.slane %v219_v63, %v146_v17 }
  0x28   :  { %270 = vst [vmem:[#allocation5] sm:$0xff] %v269_v1 }
  0x29   :  { %v234_v4 = vcombine.low %v226_v0, %v233_v2 }
  0x2b   :  { %v272_v5 = vsel %vm267_vm14, %v234_v4, %v271_v3 }
  0x2c   :  { %273 = vst [vmem:[#allocation5 + $0x8] sm:$0xff] %v272_v5 }
  0x2d   :  { %333 = shalt.err (!%p330_p12)
}
  0x2e   :  { %s334_s22 = scalar_lea.hbm %s446_s1, 256 }
  0x2f   :  { %p335_p13 = scmp.ne.s32.totalorder %s446_s1, %s334_s22  ;;  %p338_p0 = scmp.lt.u32.totalorder %s334_s22, %s446_s1 }
  0x31   :  { %p340_p1 = pnand %p338_p0, %p335_p13 }
  0x33   :  { %343 = shalt.err (!%p340_p1)
}
  0x34   :  { %283 = dma.vmem_to_hbm [thread:$0]  %s281_s18, 256, %s446_s1, [#allocation4]  }
  0x35   :  { %346 = dma.done.wait [#allocation4], 256  }
  0x36   :  { %347 = vsyncadd [#allocation4], 4294967040 }
  0x37   :  { %287 = vsyncpa [#allocation3], 1 }
  0x38   :  { %288 = vsyncpa [#allocation4], 1 }

</bundles_post_ra>
